<compile_context>
chip_gen: v7x
topology: tpu7x:2x2x1
jax: 0.10.0
libtpu: 0.0.40
codegen_flags: <defaults>
</compile_context>

<pallas_src>
import functools

import jax
import jax.numpy as jnp
from jax.experimental import pallas as pl
from jax.experimental.pallas import tpu as pltpu

LANES = 128


def tinynet_kernel(p_ref, x_ref, o_ref, *, compute_dtype):
    # p_ref: SMEM f32[2 + 2H] = [A, C, d_0..d_{H-1}, c_0..c_{H-1}]  (scalar prefetch)
    # x_ref / o_ref: VMEM f32[TR, 128] (batch mapped onto sublanes x lanes)
    # Computes y = A*x + C + sum_h c_h * |x + d_h|  (folded TinyNet forward).
    H = (p_ref.shape[0] - 2) // 2
    x = x_ref[...]                                   # f32
    xc = x.astype(compute_dtype)                     # cast once (no-op for f32)
    acc = jnp.zeros(x.shape, jnp.float32)
    for h in range(H):                               # static unroll, pure VPU
        d_h = p_ref[2 + h].astype(compute_dtype)
        c_h = p_ref[2 + H + h]                       # f32 scalar -> f32 accumulate
        acc = acc + c_h * jnp.abs(xc + d_h)
    o_ref[...] = p_ref[0] * x + p_ref[1] + acc       # A*x + C + sum_h ...


def pack_params(w1, b1, w2, b2):
    """Fold PyTorch-layout params (fc1.w (H,1), fc1.b (H,), fc2.w (1,H), fc2.b (1,))
    into abs-form constants, packed as one flat f32[2+2H] = [A, C, d_0.., c_0..].
    Uses relu(z) = 0.5*(z+|z|) and |w1h*x+b1h| = |w1h|*|x + b1h/w1h| for w1h != 0;
    units with w1h == 0 are constants and fold into C."""
    w1 = w1.reshape(-1).astype(jnp.float32)
    b1 = b1.reshape(-1).astype(jnp.float32)
    w2 = w2.reshape(-1).astype(jnp.float32)
    b2 = jnp.asarray(b2, jnp.float32).reshape(-1)
    nz = w1 != 0.0
    A = jnp.sum(jnp.where(nz, 0.5 * w2 * w1, 0.0))
    C = b2[0] + jnp.sum(jnp.where(nz, 0.5 * w2 * b1, w2 * jnp.maximum(b1, 0.0)))
    c = jnp.where(nz, 0.5 * w2 * jnp.abs(w1), 0.0)
    d = jnp.where(nz, b1 / jnp.where(nz, w1, 1.0), 0.0)
    return jnp.concatenate([jnp.stack([A, C]), d, c]).astype(jnp.float32)


def _tinynet_forward_impl(x, params, *, tr_max, compute_dtype):
    assert tr_max % 8 == 0 and tr_max > 0, "tr_max must be a positive multiple of 8"
    x_flat = x.reshape(-1).astype(jnp.float32)            # in_features == 1
    N = x_flat.shape[0]

    rows = pl.cdiv(max(N, 1), LANES)
    rows8 = pl.cdiv(rows, 8) * 8                           # sublane granularity
    n_blocks = pl.cdiv(rows8, tr_max)                      # cap tile at tr_max rows
    if rows8 >= 16:
        n_blocks = max(n_blocks, 2)                        # feed both v7x TensorCores
        if n_blocks % 2:
            n_blocks += 1                                  #   ...with balanced shards
    tr = pl.cdiv(pl.cdiv(rows8, n_blocks), 8) * 8          # <= tr_max, multiple of 8
    rows_pad = n_blocks * tr

    n_pad = rows_pad * LANES
    if n_pad != N:                                         # skip extra HBM pass if exact
        x_flat = jnp.pad(x_flat, (0, n_pad - N))
    x2 = x_flat.reshape(rows_pad, LANES)

    cp = dict(dimension_semantics=("parallel",))           # shard batch blocks across TCs
    vmem_need = 2 * 2 * tr * LANES * 4                     # double-buffered in + out
    if vmem_need > (12 << 20):                             # only if tr_max pushed past 4096
        cp["vmem_limit_bytes"] = min(vmem_need + (4 << 20), 64 << 20)

    out = pl.pallas_call(
        functools.partial(tinynet_kernel, compute_dtype=compute_dtype),
        out_shape=jax.ShapeDtypeStruct((rows_pad, LANES), jnp.float32),
        grid_spec=pltpu.PrefetchScalarGridSpec(
            num_scalar_prefetch=1,                         # params -> SMEM once, pre-grid
            grid=(n_blocks,),
            in_specs=[pl.BlockSpec((tr, LANES), lambda i, p: (i, 0))],
            out_specs=pl.BlockSpec((tr, LANES), lambda i, p: (i, 0)),  # lane-dense output
        ),
        compiler_params=pltpu.CompilerParams(**cp),
    )(params, x2)

    out_flat = out.reshape(-1)
    return out_flat if n_pad == N else out_flat[:N]        # keep the slice: padded tail != 0


_tinynet_forward_jit = jax.jit(
    _tinynet_forward_impl, static_argnames=("tr_max", "compute_dtype"))


def tinynet_forward(x, params, *, tr_max=4096, compute_dtype=jnp.float32):
    """x: [N, 1] (or [N]) f32; params: packed f32[2+2H]. Returns [N] f32."""
    return _tinynet_forward_jit(x, params, tr_max=tr_max, compute_dtype=compute_dtype)


def init_params(key, hidden=12):
    """Deterministic init with PyTorch nn.Linear shapes:
    fc1.weight (H,1), fc1.bias (H,), fc2.weight (1,H), fc2.bias (1,)."""
    k1, k2, k3, k4 = jax.random.split(key, 4)
    w1 = jax.random.normal(k1, (hidden, 1), jnp.float32) * 0.5
    b1 = jax.random.normal(k2, (hidden,), jnp.float32) * 0.1
    w2 = jax.random.normal(k3, (1, hidden), jnp.float32) * 0.5
    b2 = jax.random.normal(k4, (1,), jnp.float32) * 0.1
    return w1, b1, w2, b2


def _reference(x, w1, b1, w2, b2):
    h = jnp.maximum(x @ w1.T + b1, 0.0)
    return (h @ w2.T + b2)[:, 0]


if __name__ == "__main__":
    key = jax.random.PRNGKey(0)
    k_x, k_p = jax.random.split(key)

    N, H = 8, 12
    x = jax.random.normal(k_x, (N, 1), jnp.float32)
    w1, b1, w2, b2 = init_params(k_p, hidden=H)
    params = pack_params(w1, b1, w2, b2)

    # Small batch (single (8,128) block).
    y = jax.block_until_ready(tinynet_forward(x, params))
    y_ref = _reference(x, w1, b1, w2, b2)
    assert y.shape == (N,)
    assert jnp.allclose(y, y_ref, atol=1e-5, rtol=1e-5)

    # Larger batch exercising the multi-block path (rows=32 -> 2 blocks of (16,128),
    # no padding / no tail slice, both v7x TensorCores get a shard).
    N2 = 4096
    x2 = jax.random.normal(jax.random.PRNGKey(1), (N2, 1), jnp.float32)
    y2 = jax.block_until_ready(tinynet_forward(x2, params))
    y2_ref = _reference(x2, w1, b1, w2, b2)
    assert y2.shape == (N2,)
    assert jnp.allclose(y2, y2_ref, atol=1e-5, rtol=1e-5)

    # Optional packed-bf16 compute path (v6e/v7x VALU lever); looser tolerance.
    y3 = jax.block_until_ready(tinynet_forward(x2, params, compute_dtype=jnp.bfloat16))
    assert y3.shape == (N2,)
    assert jnp.allclose(y3, y2_ref, atol=1e-1, rtol=1e-1)

    print("KERNEL_OK")
</pallas_src>

<mosaic_0001>
module attributes {stable_mosaic.version = 11 : i64} {
  func.func @tinynet_kernel(%arg0: i32, %arg1: memref<26xf32, #tpu.memory_space<smem>>, %arg2: memref<8x128xf32, #tpu.memory_space<vmem>>, %arg3: memref<8x128xf32, #tpu.memory_space<vmem>>) attributes {dimension_semantics = [#tpu.dimension_semantics<parallel>], iteration_bounds = array<i64: 1>, scalar_prefetch = 1 : i64, scratch_operands = 0 : i64, tpu.core_type = #tpu.core_type<tc>, window_params = [{transform_indices = @transform_0, window_bounds = array<i64: 8, 128>}, {transform_indices = @transform_1, window_bounds = array<i64: 8, 128>}]} {
    %c0 = arith.constant 0 : index
    %c0_0 = arith.constant 0 : index
    %0 = vector.load %arg2[%c0, %c0_0] : memref<8x128xf32, #tpu.memory_space<vmem>>, vector<8x128xf32>
    %cst = arith.constant 0.000000e+00 : f32
    %1 = vector.broadcast %cst : f32 to vector<8x128xf32>
    %c2 = arith.constant 2 : index
    %2 = memref.load %arg1[%c2] : memref<26xf32, #tpu.memory_space<smem>>
    %c14 = arith.constant 14 : index
    %3 = memref.load %arg1[%c14] : memref<26xf32, #tpu.memory_space<smem>>
    %4 = vector.broadcast %2 : f32 to vector<8x128xf32>
    %5 = arith.addf %0, %4 : vector<8x128xf32>
    %6 = math.absf %5 : vector<8x128xf32>
    %7 = vector.broadcast %3 : f32 to vector<8x128xf32>
    %8 = arith.mulf %7, %6 : vector<8x128xf32>
    %9 = arith.addf %1, %8 : vector<8x128xf32>
    %c3 = arith.constant 3 : index
    %10 = memref.load %arg1[%c3] : memref<26xf32, #tpu.memory_space<smem>>
    %c15 = arith.constant 15 : index
    %11 = memref.load %arg1[%c15] : memref<26xf32, #tpu.memory_space<smem>>
    %12 = vector.broadcast %10 : f32 to vector<8x128xf32>
    %13 = arith.addf %0, %12 : vector<8x128xf32>
    %14 = math.absf %13 : vector<8x128xf32>
    %15 = vector.broadcast %11 : f32 to vector<8x128xf32>
    %16 = arith.mulf %15, %14 : vector<8x128xf32>
    %17 = arith.addf %9, %16 : vector<8x128xf32>
    %c4 = arith.constant 4 : index
    %18 = memref.load %arg1[%c4] : memref<26xf32, #tpu.memory_space<smem>>
    %c16 = arith.constant 16 : index
    %19 = memref.load %arg1[%c16] : memref<26xf32, #tpu.memory_space<smem>>
    %20 = vector.broadcast %18 : f32 to vector<8x128xf32>
    %21 = arith.addf %0, %20 : vector<8x128xf32>
    %22 = math.absf %21 : vector<8x128xf32>
    %23 = vector.broadcast %19 : f32 to vector<8x128xf32>
    %24 = arith.mulf %23, %22 : vector<8x128xf32>
    %25 = arith.addf %17, %24 : vector<8x128xf32>
    %c5 = arith.constant 5 : index
    %26 = memref.load %arg1[%c5] : memref<26xf32, #tpu.memory_space<smem>>
    %c17 = arith.constant 17 : index
    %27 = memref.load %arg1[%c17] : memref<26xf32, #tpu.memory_space<smem>>
    %28 = vector.broadcast %26 : f32 to vector<8x128xf32>
    %29 = arith.addf %0, %28 : vector<8x128xf32>
    %30 = math.absf %29 : vector<8x128xf32>
    %31 = vector.broadcast %27 : f32 to vector<8x128xf32>
    %32 = arith.mulf %31, %30 : vector<8x128xf32>
    %33 = arith.addf %25, %32 : vector<8x128xf32>
    %c6 = arith.constant 6 : index
    %34 = memref.load %arg1[%c6] : memref<26xf32, #tpu.memory_space<smem>>
    %c18 = arith.constant 18 : index
    %35 = memref.load %arg1[%c18] : memref<26xf32, #tpu.memory_space<smem>>
    %36 = vector.broadcast %34 : f32 to vector<8x128xf32>
    %37 = arith.addf %0, %36 : vector<8x128xf32>
    %38 = math.absf %37 : vector<8x128xf32>
    %39 = vector.broadcast %35 : f32 to vector<8x128xf32>
    %40 = arith.mulf %39, %38 : vector<8x128xf32>
    %41 = arith.addf %33, %40 : vector<8x128xf32>
    %c7 = arith.constant 7 : index
    %42 = memref.load %arg1[%c7] : memref<26xf32, #tpu.memory_space<smem>>
    %c19 = arith.constant 19 : index
    %43 = memref.load %arg1[%c19] : memref<26xf32, #tpu.memory_space<smem>>
    %44 = vector.broadcast %42 : f32 to vector<8x128xf32>
    %45 = arith.addf %0, %44 : vector<8x128xf32>
    %46 = math.absf %45 : vector<8x128xf32>
    %47 = vector.broadcast %43 : f32 to vector<8x128xf32>
    %48 = arith.mulf %47, %46 : vector<8x128xf32>
    %49 = arith.addf %41, %48 : vector<8x128xf32>
    %c8 = arith.constant 8 : index
    %50 = memref.load %arg1[%c8] : memref<26xf32, #tpu.memory_space<smem>>
    %c20 = arith.constant 20 : index
    %51 = memref.load %arg1[%c20] : memref<26xf32, #tpu.memory_space<smem>>
    %52 = vector.broadcast %50 : f32 to vector<8x128xf32>
    %53 = arith.addf %0, %52 : vector<8x128xf32>
    %54 = math.absf %53 : vector<8x128xf32>
    %55 = vector.broadcast %51 : f32 to vector<8x128xf32>
    %56 = arith.mulf %55, %54 : vector<8x128xf32>
    %57 = arith.addf %49, %56 : vector<8x128xf32>
    %c9 = arith.constant 9 : index
    %58 = memref.load %arg1[%c9] : memref<26xf32, #tpu.memory_space<smem>>
    %c21 = arith.constant 21 : index
    %59 = memref.load %arg1[%c21] : memref<26xf32, #tpu.memory_space<smem>>
    %60 = vector.broadcast %58 : f32 to vector<8x128xf32>
    %61 = arith.addf %0, %60 : vector<8x128xf32>
    %62 = math.absf %61 : vector<8x128xf32>
    %63 = vector.broadcast %59 : f32 to vector<8x128xf32>
    %64 = arith.mulf %63, %62 : vector<8x128xf32>
    %65 = arith.addf %57, %64 : vector<8x128xf32>
    %c10 = arith.constant 10 : index
    %66 = memref.load %arg1[%c10] : memref<26xf32, #tpu.memory_space<smem>>
    %c22 = arith.constant 22 : index
    %67 = memref.load %arg1[%c22] : memref<26xf32, #tpu.memory_space<smem>>
    %68 = vector.broadcast %66 : f32 to vector<8x128xf32>
    %69 = arith.addf %0, %68 : vector<8x128xf32>
    %70 = math.absf %69 : vector<8x128xf32>
    %71 = vector.broadcast %67 : f32 to vector<8x128xf32>
    %72 = arith.mulf %71, %70 : vector<8x128xf32>
    %73 = arith.addf %65, %72 : vector<8x128xf32>
    %c11 = arith.constant 11 : index
    %74 = memref.load %arg1[%c11] : memref<26xf32, #tpu.memory_space<smem>>
    %c23 = arith.constant 23 : index
    %75 = memref.load %arg1[%c23] : memref<26xf32, #tpu.memory_space<smem>>
    %76 = vector.broadcast %74 : f32 to vector<8x128xf32>
    %77 = arith.addf %0, %76 : vector<8x128xf32>
    %78 = math.absf %77 : vector<8x128xf32>
    %79 = vector.broadcast %75 : f32 to vector<8x128xf32>
    %80 = arith.mulf %79, %78 : vector<8x128xf32>
    %81 = arith.addf %73, %80 : vector<8x128xf32>
    %c12 = arith.constant 12 : index
    %82 = memref.load %arg1[%c12] : memref<26xf32, #tpu.memory_space<smem>>
    %c24 = arith.constant 24 : index
    %83 = memref.load %arg1[%c24] : memref<26xf32, #tpu.memory_space<smem>>
    %84 = vector.broadcast %82 : f32 to vector<8x128xf32>
    %85 = arith.addf %0, %84 : vector<8x128xf32>
    %86 = math.absf %85 : vector<8x128xf32>
    %87 = vector.broadcast %83 : f32 to vector<8x128xf32>
    %88 = arith.mulf %87, %86 : vector<8x128xf32>
    %89 = arith.addf %81, %88 : vector<8x128xf32>
    %c13 = arith.constant 13 : index
    %90 = memref.load %arg1[%c13] : memref<26xf32, #tpu.memory_space<smem>>
    %c25 = arith.constant 25 : index
    %91 = memref.load %arg1[%c25] : memref<26xf32, #tpu.memory_space<smem>>
    %92 = vector.broadcast %90 : f32 to vector<8x128xf32>
    %93 = arith.addf %0, %92 : vector<8x128xf32>
    %94 = math.absf %93 : vector<8x128xf32>
    %95 = vector.broadcast %91 : f32 to vector<8x128xf32>
    %96 = arith.mulf %95, %94 : vector<8x128xf32>
    %97 = arith.addf %89, %96 : vector<8x128xf32>
    %c0_1 = arith.constant 0 : index
    %98 = memref.load %arg1[%c0_1] : memref<26xf32, #tpu.memory_space<smem>>
    %99 = vector.broadcast %98 : f32 to vector<8x128xf32>
    %100 = arith.mulf %99, %0 : vector<8x128xf32>
    %c1 = arith.constant 1 : index
    %101 = memref.load %arg1[%c1] : memref<26xf32, #tpu.memory_space<smem>>
    %102 = vector.broadcast %101 : f32 to vector<8x128xf32>
    %103 = arith.addf %100, %102 : vector<8x128xf32>
    %104 = arith.addf %103, %97 : vector<8x128xf32>
    %c0_2 = arith.constant 0 : index
    %c0_3 = arith.constant 0 : index
    %105 = vector.load %arg3[%c0_2, %c0_3] : memref<8x128xf32, #tpu.memory_space<vmem>>, vector<8x128xf32>
    tpu.vector_store %arg3[%c0_2, %c0_3], %104 {strides = array<i32>} : memref<8x128xf32, #tpu.memory_space<vmem>>, vector<8x128xf32>,
    return
  }
  func.func @transform_0(%arg0: i32, %arg1: memref<26xf32, #tpu.memory_space<smem>>) -> (i32, i32) {
    %c0_i32 = arith.constant 0 : i32
    %c0_i32_0 = arith.constant 0 : i32
    return %arg0, %c0_i32 : i32, i32
  }
  func.func @transform_1(%arg0: i32, %arg1: memref<26xf32, #tpu.memory_space<smem>>) -> (i32, i32) {
    %c0_i32 = arith.constant 0 : i32
    %c0_i32_0 = arith.constant 0 : i32
    return %arg0, %c0_i32 : i32, i32
  }
}

</mosaic_0001>

<bundles_post_ra>
// kernel: _tinynet_forward_impl.1
= control target key start
LH: loop header
LB: loop body
LE: loop exit
PB: predicated region body
PF: predicated region fallthrough
CT: control target
= control target key end

     0   :  { %s261_s0 = inlined_call_operand.vmem [shape: f32[26], index: 0, kind: input, shape index: {}]   ;;  %s262_s1 = inlined_call_operand.vmem [shape: f32[8,128], index: 1, kind: input, shape index: {}]   ;;  %s263_s2 = inlined_call_operand.vmem [shape: f32[8,128], index: 2, kind: output, shape index: {}]  }
   0x1   :  { %s7_s11 = sshll.u32 %s261_s0, 4  ;;  %s8_s11 = int_to_ptr.vmem [resolvable:$true] %s7_s11 }
   0x2   :  { %s150_s12 = scalar_lea.vmem %s8_s11, 16  ;;  %p155_p1 = scmp.lt.s32.totalorder %s8_s11, %s8_s11 }
   0x3   :  { %p151_p0 = scmp.ne.s32.totalorder %s8_s11, %s150_s12  ;;  %p156_p2 = scmp.lt.s32.totalorder %s150_s12, %s150_s12 }
   0x5   :  { %p157_p3 = por %p156_p2, %p155_p1 }
   0x7   :  { %p158_p4 = pnand %p157_p3, %p151_p0 }
   0x9   :  { %161 = shalt.err (!%p158_p4)  }
   0xa   :  { %s164_s13 = smov [#allocation3]  }
   0xb   :  { %10 = dma.vmem_to_smem %s8_s11, 16, %s164_s13, [#allocation2] }
   0xc   :  { %162 = dma.done.wait [#allocation2], 16 }
   0xd   :  { %163 = vsyncadd [#allocation2], 4294967280 }
   0xe   :  { %12 = sfence }
   0xf   :  { %s124_s14 = sld [smem:[#allocation3 + $0x2]]  ;;  %s183_s15 = sld [smem:[#allocation3 + $0xe]]  ;;  %v194_v0 = vld [vmem:[%s262_s1] sm:$0xff] }
  0x10   :  { %s126_s16 = sld [smem:[#allocation3 + $0x3]]  ;;  %s185_s17 = sld [smem:[#allocation3 + $0xf]] }
  0x11   :  { %s128_s0 = sld [smem:[#allocation3 + $0x4]]  ;;  %s187_s18 = sld [smem:[#allocation3 + $0x10]] }
  0x12   :  { %s130_s19 = sld [smem:[#allocation3 + $0x5]]  ;;  %s189_s20 = sld [smem:[#allocation3 + $0x11]] }
  0x13   :  { %s132_s23 = sld [smem:[#allocation3 + $0x6]]  ;;  %s196_s24 = sld [smem:[#allocation3 + $0x12]] }
  0x14   :  { %s198_s25 = sld [smem:[#allocation3 + $0x7]]  ;;  %s200_s26 = sld [smem:[#allocation3 + $0x8]] }
  0x15   :  { %v18_v1 = vstv %s124_s14  ;;  %s203_s27 = sld [smem:[#allocation3 + $0x13]]  ;;  %s205_s28 = sld [smem:[#allocation3 + $0x9]]  ;;  %v21_v4 = vstv %s183_s15 }
  0x16   :  { %v19_v2 = vadd.f32 %v18_v1, %v194_v0  ;;  %v26_v3 = vstv %s126_s16  ;;  %v29_v6 = vstv %s185_s17  ;;  %s210_s1 = sld [smem:[#allocation3 + $0xa]]  ;;  %s214_s29 = sld [smem:[#allocation3 + $0x14]] }
  0x17   :  { %v27_v5 = vadd.f32 %v26_v3, %v194_v0  ;;  %v34_v7 = vstv %s128_s0  ;;  %v37_v10 = vstv %s187_s18  ;;  %s216_s30 = sld [smem:[#allocation3 + $0xb]]  ;;  %s220_s3 = sld [smem:[#allocation3 + $0x15]] }
  0x18   :  { %v20_v8 = vand.u32 2147483647, %v19_v2  ;;  %v35_v9 = vadd.f32 %v34_v7, %v194_v0  ;;  %v42_v11 = vstv %s130_s19  ;;  %v45_v14 = vstv %s189_s20  ;;  %s224_s4 = sld [smem:[#allocation3 + $0xc]]  ;;  %s226_s5 = sld [smem:[#allocation3 + $0xd]] }
  0x19   :  { %v28_v12 = vand.u32 2147483647, %v27_v5  ;;  %v43_v13 = vadd.f32 %v42_v11, %v194_v0  ;;  %v50_v15 = vstv %s132_s23  ;;  %v53_v25 = vstv %s196_s24  ;;  %s231_s6 = sld [smem:[#allocation3 + $0x16]]  ;;  %s237_s7 = sld [smem:[#allocation3 + $0x17]] }
  0x1a   :  { %v22_v16 = vmul.f32 %v21_v4, %v20_v8  ;;  %v36_v17 = vand.u32 2147483647, %v35_v9  ;;  %v51_v18 = vadd.f32 %v50_v15, %v194_v0  ;;  %v58_v19 = vstv %s198_s25  ;;  %s243_s8 = sld [smem:[#allocation3 + $0x18]]  ;;  %s147_s10 = sld [smem:[#allocation3 + $0x19]] }
  0x1b   :  { %v30_v20 = vmul.f32 %v29_v6, %v28_v12  ;;  %v44_v21 = vand.u32 2147483647, %v43_v13  ;;  %v59_v22 = vadd.f32 %v58_v19, %v194_v0  ;;  %v66_v26 = vstv %s200_s26  ;;  %s245_s9 = sld [smem:[#allocation3]]  ;;  %s148_s11 = sld [smem:[#allocation3 + $0x1]] }
  0x1c   :  { %v38_v23 = vmul.f32 %v37_v10, %v36_v17  ;;  %v52_v24 = vand.u32 2147483647, %v51_v18  ;;  %v67_v30 = vadd.f32 %v66_v26, %v194_v0  ;;  %v61_v31 = vstv %s203_s27 }
  0x1d   :  { %v31_v27 = vadd.f32 %v30_v20, %v22_v16  ;;  %v46_v28 = vmul.f32 %v45_v14, %v44_v21  ;;  %v60_v29 = vand.u32 2147483647, %v59_v22  ;;  %v74_v32 = vstv %s205_s28 }
  0x1e   :  { %v82_v33 = vstv %s210_s1  ;;  %v54_v35 = vmul.f32 %v53_v25, %v52_v24  ;;  %v68_v36 = vand.u32 2147483647, %v67_v30  ;;  %v75_v37 = vadd.f32 %v74_v32, %v194_v0 }
  0x1f   :  { %v39_v34 = vadd.f32 %v38_v23, %v31_v27  ;;  %v69_v38 = vstv %s214_s29  ;;  %v83_v39 = vadd.f32 %v82_v33, %v194_v0  ;;  %v90_v40 = vstv %s216_s30 }
  0x20   :  { %v62_v42 = vmul.f32 %v61_v31, %v60_v29  ;;  %v76_v43 = vand.u32 2147483647, %v75_v37  ;;  %v91_v44 = vadd.f32 %v90_v40, %v194_v0  ;;  %v77_v45 = vstv %s220_s3 }
  0x21   :  { %v47_v41 = vadd.f32 %v46_v28, %v39_v34  ;;  %v98_v46 = vstv %s224_s4  ;;  %v106_v47 = vstv %s226_s5  ;;  %v70_v49 = vmul.f32 %v69_v38, %v68_v36 }
  0x22   :  { %v84_v50 = vand.u32 2147483647, %v83_v39  ;;  %v99_v51 = vadd.f32 %v98_v46, %v194_v0  ;;  %v85_v52 = vstv %s231_s6  ;;  %v78_v54 = vmul.f32 %v77_v45, %v76_v43 }
  0x23   :  { %v55_v48 = vadd.f32 %v54_v35, %v47_v41  ;;  %v92_v55 = vand.u32 2147483647, %v91_v44  ;;  %v107_v56 = vadd.f32 %v106_v47, %v194_v0  ;;  %v93_v57 = vstv %s237_s7 }
  0x24   :  { %v86_v59 = vmul.f32 %v85_v52, %v84_v50  ;;  %v100_v60 = vand.u32 2147483647, %v99_v51  ;;  %v101_v61 = vstv %s243_s8  ;;  %v113_v62 = vstv %s245_s9 }
  0x25   :  { %v63_v53 = vadd.f32 %v62_v42, %v55_v48  ;;  %v94_v1 = vmul.f32 %v93_v57, %v92_v55  ;;  %v108_v2 = vand.u32 2147483647, %v107_v56  ;;  %v109_v3 = vstv %s147_s10 }
  0x26   :  { %v102_v5 = vmul.f32 %v101_v61, %v100_v60  ;;  %v114_v6 = vmul.f32 %v113_v62, %v194_v0  ;;  %v116_v7 = vstv %s148_s11 }
  0x27   :  { %v71_v58 = vadd.f32 %v70_v49, %v63_v53  ;;  %v110_v9 = vmul.f32 %v109_v3, %v108_v2 }
  0x28   :  { %v117_v11 = vadd.f32 %v116_v7, %v114_v6 }
  0x29   :  { %v79_v63 = vadd.f32 %v78_v54, %v71_v58 }
  0x2b   :  { %v87_v4 = vadd.f32 %v86_v59, %v79_v63 }
  0x2d   :  { %v95_v8 = vadd.f32 %v94_v1, %v87_v4 }
  0x2f   :  { %v103_v10 = vadd.f32 %v102_v5, %v95_v8 }
  0x31   :  { %v111_v12 = vadd.f32 %v110_v9, %v103_v10 }
  0x33   :  { %v118_v13 = vadd.f32 %v117_v11, %v111_v12 }
  0x35   :  { %119 = vst [vmem:[%s263_s2] sm:$0xff] %v118_v13 }

</bundles_post_ra>
